<compile_context>
chip_gen: v7x
topology: tpu7x:2x2x1
jax: 0.10.0
libtpu: 0.0.40
codegen_flags: <defaults>
</compile_context>

<pallas_src>
import functools

import jax
import jax.numpy as jnp
from jax import lax
from jax.experimental import pallas as pl
from jax.experimental.pallas import tpu as pltpu

THRESH = 1.0  # snntorch Leaky default threshold (folded below since == 1.0)


def _round_up(x, m):
    return (x + m - 1) // m * m


def _pick_chunk(t, max_chunk):
    """Largest divisor of t that is <= max_chunk (so T % CHUNK == 0)."""
    for c in range(min(max_chunk, t), 0, -1):
        if t % c == 0:
            return c
    return 1


# ---------------------------------------------------------------------------
# shared cell math (one SNN timestep on already-loaded VMEM values)
# ---------------------------------------------------------------------------
def _snn_cell(x, w1, b1, w2, b2, mem1_prev, mem2_prev, *, nr_ins, beta1, beta2):
    # lin1 (VPU): tiny K = nr_ins contraction as unrolled broadcast-FMAs.
    # Normalization is pre-folded into w1/b1.
    cur1 = b1                                               # (1, Hp)
    for k in range(nr_ins):
        cur1 = cur1 + x[:, k:k + 1] * w1[k:k + 1, :]        # (Bp,1)*(1,Hp)

    # lif1: Leaky, reset-by-subtraction, heaviside forward (FastSigmoid fwd).
    reset1 = jnp.where(mem1_prev > THRESH, 1.0, 0.0)
    mem1_new = beta1 * mem1_prev + cur1 - reset1            # THRESH == 1.0 folded
    spk1 = jnp.where(mem1_new > THRESH, 1.0, 0.0)

    # actor_linear on the MXU: bf16 weights, f32 accumulation.
    actions = jnp.dot(spk1.astype(w2.dtype), w2,
                      preferred_element_type=jnp.float32) + b2

    # lif_actor: reset_mechanism='none'  =>  mem2 = beta2*mem2 + actions
    if beta2 == 0.0:          # trace-time specialization (beta is a constant)
        mem2_new = actions
    else:
        mem2_new = beta2 * mem2_prev + actions
    return mem1_new, mem2_new


# ---------------------------------------------------------------------------
# kernels
# ---------------------------------------------------------------------------
def _snn_step_kernel(x_ref, w1_ref, b1_ref, w2_ref, b2_ref,
                     mem1_ref, mem2_ref, mem1_out_ref, mem2_out_ref,
                     *, nr_ins, beta1, beta2):
    mem1_new, mem2_new = _snn_cell(
        x_ref[...], w1_ref[...], b1_ref[...], w2_ref[...], b2_ref[...],
        mem1_ref[...], mem2_ref[...],
        nr_ins=nr_ins, beta1=beta1, beta2=beta2)
    mem1_out_ref[...] = mem1_new
    mem2_out_ref[...] = mem2_new


def _snn_rollout_kernel(x_ref, w1_ref, b1_ref, w2_ref, b2_ref,
                        mem1_in_ref, mem2_in_ref,
                        act_ref, mem1_out_ref, mem2_out_ref,
                        *, nr_ins, chunk, beta1, beta2):
    """Fused rollout: CHUNK timesteps per grid iteration.

    Recurrent state is carried in the mem1_out/mem2_out refs (constant-index
    out BlockSpecs keep them VMEM-resident across the whole grid); no scratch.
    """
    c = pl.program_id(0)

    @pl.when(c == 0)
    def _():
        mem1_out_ref[...] = mem1_in_ref[...]
        mem2_out_ref[...] = mem2_in_ref[...]

    # Hoist weight / bias loads out of the inner (unrolled) loop.
    w1 = w1_ref[...]
    b1 = b1_ref[...]
    w2 = w2_ref[...]
    b2 = b2_ref[...]

    def body(i, carry):
        mem1_prev, mem2_prev = carry
        x = x_ref[i]                                        # (Bp, nin)
        mem1_new, mem2_new = _snn_cell(
            x, w1, b1, w2, b2, mem1_prev, mem2_prev,
            nr_ins=nr_ins, beta1=beta1, beta2=beta2)
        act_ref[i] = mem2_new          # forward() returns actions = self.mem2
        return mem1_new, mem2_new

    mem1_fin, mem2_fin = lax.fori_loop(
        0, chunk, body, (mem1_out_ref[...], mem2_out_ref[...]), unroll=True)

    mem1_out_ref[...] = mem1_fin
    mem2_out_ref[...] = mem2_fin


# ---------------------------------------------------------------------------
# wrappers
# ---------------------------------------------------------------------------
def prepare_params(params, batch):
    """Pad / cast / fold parameters ONCE (hoisted out of the per-step path)."""
    nin, H = params["w1"].shape
    O = params["w2"].shape[1]
    Bp = _round_up(max(int(batch), 1), 8)
    Hp = _round_up(int(H), 128)
    Op = _round_up(int(O), 128)

    inp_min = params["inp_min"].astype(jnp.float32)
    inp_max = params["inp_max"].astype(jnp.float32)
    # TODO(synk): like the torch module, a degenerate range (max == min)
    # produces inf/nan here; guard upstream if ranges can be degenerate.
    inp_inv = 1.0 / (inp_max - inp_min)

    # Fold input normalization into lin1:  x_norm @ W1 + b1
    #   == x @ (inp_inv[:,None]*W1) + (b1 - (inp_min*inp_inv) @ W1)
    w1f = params["w1"].astype(jnp.float32) * inp_inv[:, None]
    b1f = (params["b1"].astype(jnp.float32)
           - (inp_min * inp_inv) @ params["w1"].astype(jnp.float32))

    def pad2(a, r, c):
        # NOTE: padded lanes MUST be exactly 0.0 (see padding invariants).
        return jnp.pad(a, ((0, r - a.shape[0]), (0, c - a.shape[1])))

    return dict(
        nr_ins=int(nin), hidden=int(H), nr_outs=int(O),
        Bp=Bp, Hp=Hp, Op=Op,
        beta1=float(jnp.clip(params["beta1"], 0.0, 1.0)),
        beta2=float(jnp.clip(params["beta2"], 0.0, 1.0)),
        w1=pad2(w1f, nin, Hp),                               # (nin, Hp) f32 (VPU)
        b1=pad2(b1f.reshape(1, -1), 1, Hp),                  # (1, Hp)   f32
        w2=pad2(params["w2"].astype(jnp.float32), Hp, Op).astype(jnp.bfloat16),
        b2=pad2(params["b2"].reshape(1, -1).astype(jnp.float32), 1, Op),
    )


def make_forward_fns(params, batch, max_chunk=8):
    """Builds (prep, step, rollout).

    step(x, mem1_p, mem2_p)           x: (B, nin) unpadded (padded inside jit).
    rollout(x_seq_p, mem1_p, mem2_p)  x_seq_p: (T, Bp, nin), T % chunk == 0
                                      (chunk = largest divisor of T <= max_chunk).
    State stays in its padded (Bp, Hp)/(Bp, Op) layout across steps; slice
    [:batch, :nr_outs] only when an unpadded view is actually needed.
    """
    prep = prepare_params(params, batch)
    nin, Bp, Hp, Op = prep["nr_ins"], prep["Bp"], prep["Hp"], prep["Op"]
    beta1, beta2 = prep["beta1"], prep["beta2"]

    vmem = pl.BlockSpec(memory_space=pltpu.MemorySpace.VMEM)
    step_call = pl.pallas_call(
        functools.partial(_snn_step_kernel, nr_ins=nin, beta1=beta1, beta2=beta2),
        out_shape=(jax.ShapeDtypeStruct((Bp, Hp), jnp.float32),
                   jax.ShapeDtypeStruct((Bp, Op), jnp.float32)),
        in_specs=[vmem] * 7,
        out_specs=(vmem, vmem),
        # State updated in place (mem1 -> out0, mem2 -> out1); callers can
        # additionally donate the state buffers for a fully copy-free update.
        input_output_aliases={5: 0, 6: 1},
    )

    @jax.jit
    def step(x, mem1_p, mem2_p):
        x_p = jnp.pad(x.astype(jnp.float32), ((0, Bp - x.shape[0]), (0, 0)))
        mem1_new, mem2_new = step_call(
            x_p, prep["w1"], prep["b1"], prep["w2"], prep["b2"],
            mem1_p, mem2_p)
        # module returns (0, actions) with actions = self.mem2
        return (0, mem2_new), mem1_new, mem2_new

    @jax.jit
    def rollout(x_seq_p, mem1_p, mem2_p):
        T = x_seq_p.shape[0]
        chunk = _pick_chunk(T, max_chunk)
        n_chunks = T // chunk
        roll_kernel = functools.partial(
            _snn_rollout_kernel, nr_ins=nin, chunk=chunk,
            beta1=beta1, beta2=beta2)
        acts, mem1_new, mem2_new = pl.pallas_call(
            roll_kernel,
            out_shape=(jax.ShapeDtypeStruct((T, Bp, Op), jnp.float32),
                       jax.ShapeDtypeStruct((Bp, Hp), jnp.float32),
                       jax.ShapeDtypeStruct((Bp, Op), jnp.float32)),
            grid=(n_chunks,),
            in_specs=[
                pl.BlockSpec((chunk, Bp, nin), lambda c: (c, 0, 0)),  # x chunk
                pl.BlockSpec((nin, Hp), lambda c: (0, 0)),            # w1 (folded)
                pl.BlockSpec((1, Hp), lambda c: (0, 0)),              # b1 (folded)
                pl.BlockSpec((Hp, Op), lambda c: (0, 0)),             # w2 (bf16)
                pl.BlockSpec((1, Op), lambda c: (0, 0)),              # b2
                pl.BlockSpec((Bp, Hp), lambda c: (0, 0)),             # mem1_in
                pl.BlockSpec((Bp, Op), lambda c: (0, 0)),             # mem2_in
            ],
            out_specs=(
                pl.BlockSpec((chunk, Bp, Op), lambda c: (c, 0, 0)),   # actions
                pl.BlockSpec((Bp, Hp), lambda c: (0, 0)),             # mem1_out
                pl.BlockSpec((Bp, Op), lambda c: (0, 0)),             # mem2_out
            ),
            # T is a true recurrence -> "arbitrary".
            # TODO(synk): for large vectorized-env batches on v7x, add a
            # leading batch-chunk grid axis marked "parallel" to use both TCs.
            compiler_params=pltpu.CompilerParams(
                dimension_semantics=("arbitrary",)),
        )(x_seq_p, prep["w1"], prep["b1"], prep["w2"], prep["b2"],
          mem1_p, mem2_p)
        return acts, mem1_new, mem2_new

    return prep, step, rollout


# ---------------------------------------------------------------------------
# test
# ---------------------------------------------------------------------------
if __name__ == "__main__":
    # Shapes consistent with the module: nr_ins=4 (CartPole-like obs),
    # hidden_size=32, nr_outs (= action_space.n) = 6, batch=2.
    B, NIN, H, NOUT = 2, 4, 32, 6
    T = 32  # rollout length; chunked into grid of T/8 with 8 fused steps each

    key = jax.random.PRNGKey(0)
    k0, k1, k2, k3, k4, k5 = jax.random.split(key, 6)
    lim1 = 1.0 / jnp.sqrt(jnp.float32(NIN))
    lim2 = 1.0 / jnp.sqrt(jnp.float32(H))

    params = dict(
        w1=jax.random.uniform(k0, (NIN, H), jnp.float32, -lim1, lim1),
        b1=jax.random.uniform(k1, (H,), jnp.float32, -lim1, lim1),
        w2=jax.random.uniform(k2, (H, NOUT), jnp.float32, -lim2, lim2),
        b2=jax.random.uniform(k3, (NOUT,), jnp.float32, -lim2, lim2),
        beta1=jnp.float32(0.45),    # self.lif1 beta (learn_beta=True)
        beta2=jnp.float32(0.0),     # self.lif_actor beta
        inp_min=jnp.zeros((NIN,), jnp.float32),
        inp_max=2.0 * jnp.ones((NIN,), jnp.float32),
    )

    prep, snn_step, snn_rollout = make_forward_fns(params, batch=B, max_chunk=8)
    Bp, Hp, Op = prep["Bp"], prep["Hp"], prep["Op"]
    beta1, beta2 = prep["beta1"], prep["beta2"]

    # --- plain-JAX reference (same folded weights / accumulation order) -----
    w1_ref = prep["w1"][:NIN, :H]
    b1_ref = prep["b1"][0, :H]
    w2_q = params["w2"].astype(jnp.bfloat16).astype(jnp.float32)

    def ref_step(x, mem1, mem2):
        cur1 = jnp.broadcast_to(b1_ref[None, :], (x.shape[0], H))
        for k in range(NIN):
            cur1 = cur1 + x[:, k:k + 1] * w1_ref[k:k + 1, :]
        reset1 = (mem1 > THRESH).astype(jnp.float32)
        mem1_n = beta1 * mem1 + cur1 - reset1 * THRESH
        spk1 = (mem1_n > THRESH).astype(jnp.float32)
        act = spk1 @ w2_q + params["b2"]
        mem2_n = beta2 * mem2 + act
        return mem1_n, mem2_n

    # --- single-step kernel over 3 consecutive env steps --------------------
    x_steps = jax.random.uniform(k4, (3, B, NIN), jnp.float32, 0.0, 2.0)

    mem1_r = jnp.zeros((B, H), jnp.float32)
    mem2_r = jnp.zeros((B, NOUT), jnp.float32)
    mem1_p = jnp.zeros((Bp, Hp), jnp.float32)   # padded state, stays padded
    mem2_p = jnp.zeros((Bp, Op), jnp.float32)

    for s in range(x_steps.shape[0]):
        x = x_steps[s]
        (zero, actions_p), mem1_p, mem2_p = snn_step(x, mem1_p, mem2_p)
        jax.block_until_ready((actions_p, mem1_p, mem2_p))
        mem1_r, mem2_r = ref_step(x, mem1_r, mem2_r)
        assert int(zero) == 0
        assert jnp.allclose(mem1_p[:B, :H], mem1_r, atol=1e-4), "mem1 mismatch"
        assert jnp.allclose(actions_p[:B, :NOUT], mem2_r, atol=1e-4), "actions mismatch"

    # --- fused chunked T-step rollout kernel ---------------------------------
    x_seq = jax.random.uniform(k5, (T, B, NIN), jnp.float32, 0.0, 2.0)
    x_seq_p = jnp.pad(x_seq, ((0, 0), (0, Bp - B), (0, 0)))
    acts_p, mem1_fp, mem2_fp = snn_rollout(
        x_seq_p,
        jnp.zeros((Bp, Hp), jnp.float32),
        jnp.zeros((Bp, Op), jnp.float32))
    jax.block_until_ready((acts_p, mem1_fp, mem2_fp))

    m1 = jnp.zeros((B, H), jnp.float32)
    m2 = jnp.zeros((B, NOUT), jnp.float32)
    for s in range(T):
        m1, m2 = ref_step(x_seq[s], m1, m2)
        assert jnp.allclose(acts_p[s, :B, :NOUT], m2, atol=1e-4), \
            f"rollout actions mismatch @t={s}"
    assert jnp.allclose(mem1_fp[:B, :H], m1, atol=1e-4), "rollout final mem1 mismatch"
    assert jnp.allclose(mem2_fp[:B, :NOUT], m2, atol=1e-4), "rollout final mem2 mismatch"

    # TODO(synk): the torch module's host-side recording lists (self.inputs
    # .append / .detach().numpy()) and plot_spikes (matplotlib animation) are
    # host bookkeeping, not kernel work.
    print("KERNEL_OK")
</pallas_src>

<mosaic_0001>
module attributes {stable_mosaic.version = 11 : i64} {
  func.func @_snn_step_kernel(%arg0: memref<8x4xf32, #tpu.memory_space<vmem>>, %arg1: memref<4x128xf32, #tpu.memory_space<vmem>>, %arg2: memref<1x128xf32, #tpu.memory_space<vmem>>, %arg3: memref<128x128xbf16, #tpu.memory_space<vmem>>, %arg4: memref<1x128xf32, #tpu.memory_space<vmem>>, %arg5: memref<8x128xf32, #tpu.memory_space<vmem>>, %arg6: memref<8x128xf32, #tpu.memory_space<vmem>>, %arg7: memref<8x128xf32, #tpu.memory_space<vmem>>, %arg8: memref<8x128xf32, #tpu.memory_space<vmem>>) attributes {dimension_semantics = [], scalar_prefetch = 0 : i64, scratch_operands = 0 : i64, tpu.core_type = #tpu.core_type<tc>} {
    %c0 = arith.constant 0 : index
    %c0_0 = arith.constant 0 : index
    %0 = vector.load %arg0[%c0, %c0_0] : memref<8x4xf32, #tpu.memory_space<vmem>>, vector<8x4xf32>
    %c0_1 = arith.constant 0 : index
    %c0_2 = arith.constant 0 : index
    %1 = vector.load %arg1[%c0_1, %c0_2] : memref<4x128xf32, #tpu.memory_space<vmem>>, vector<4x128xf32>
    %c0_3 = arith.constant 0 : index
    %c0_4 = arith.constant 0 : index
    %2 = vector.load %arg2[%c0_3, %c0_4] : memref<1x128xf32, #tpu.memory_space<vmem>>, vector<1x128xf32>
    %c0_5 = arith.constant 0 : index
    %c0_6 = arith.constant 0 : index
    %3 = vector.load %arg3[%c0_5, %c0_6] : memref<128x128xbf16, #tpu.memory_space<vmem>>, vector<128x128xbf16>
    %c0_7 = arith.constant 0 : index
    %c0_8 = arith.constant 0 : index
    %4 = vector.load %arg4[%c0_7, %c0_8] : memref<1x128xf32, #tpu.memory_space<vmem>>, vector<1x128xf32>
    %c0_9 = arith.constant 0 : index
    %c0_10 = arith.constant 0 : index
    %5 = vector.load %arg5[%c0_9, %c0_10] : memref<8x128xf32, #tpu.memory_space<vmem>>, vector<8x128xf32>
    %6 = vector.extract_strided_slice %0 {offsets = [0, 0], sizes = [8, 1], strides = [1, 1]} : vector<8x4xf32> to vector<8x1xf32>
    %7 = vector.extract_strided_slice %1 {offsets = [0, 0], sizes = [1, 128], strides = [1, 1]} : vector<4x128xf32> to vector<1x128xf32>
    %8 = vector.broadcast %6 : vector<8x1xf32> to vector<8x128xf32>
    %9 = vector.broadcast %7 : vector<1x128xf32> to vector<8x128xf32>
    %10 = arith.mulf %8, %9 : vector<8x128xf32>
    %11 = vector.broadcast %2 : vector<1x128xf32> to vector<8x128xf32>
    %12 = arith.addf %11, %10 : vector<8x128xf32>
    %13 = vector.extract_strided_slice %0 {offsets = [0, 1], sizes = [8, 1], strides = [1, 1]} : vector<8x4xf32> to vector<8x1xf32>
    %14 = vector.extract_strided_slice %1 {offsets = [1, 0], sizes = [1, 128], strides = [1, 1]} : vector<4x128xf32> to vector<1x128xf32>
    %15 = vector.broadcast %13 : vector<8x1xf32> to vector<8x128xf32>
    %16 = vector.broadcast %14 : vector<1x128xf32> to vector<8x128xf32>
    %17 = arith.mulf %15, %16 : vector<8x128xf32>
    %18 = arith.addf %12, %17 : vector<8x128xf32>
    %19 = vector.extract_strided_slice %0 {offsets = [0, 2], sizes = [8, 1], strides = [1, 1]} : vector<8x4xf32> to vector<8x1xf32>
    %20 = vector.extract_strided_slice %1 {offsets = [2, 0], sizes = [1, 128], strides = [1, 1]} : vector<4x128xf32> to vector<1x128xf32>
    %21 = vector.broadcast %19 : vector<8x1xf32> to vector<8x128xf32>
    %22 = vector.broadcast %20 : vector<1x128xf32> to vector<8x128xf32>
    %23 = arith.mulf %21, %22 : vector<8x128xf32>
    %24 = arith.addf %18, %23 : vector<8x128xf32>
    %25 = vector.extract_strided_slice %0 {offsets = [0, 3], sizes = [8, 1], strides = [1, 1]} : vector<8x4xf32> to vector<8x1xf32>
    %26 = vector.extract_strided_slice %1 {offsets = [3, 0], sizes = [1, 128], strides = [1, 1]} : vector<4x128xf32> to vector<1x128xf32>
    %27 = vector.broadcast %25 : vector<8x1xf32> to vector<8x128xf32>
    %28 = vector.broadcast %26 : vector<1x128xf32> to vector<8x128xf32>
    %29 = arith.mulf %27, %28 : vector<8x128xf32>
    %30 = arith.addf %24, %29 : vector<8x128xf32>
    %cst = arith.constant 1.000000e+00 : f32
    %31 = vector.broadcast %cst : f32 to vector<8x128xf32>
    %32 = arith.cmpf ogt, %5, %31 : vector<8x128xf32>
    %cst_11 = arith.constant 1.000000e+00 : f32
    %cst_12 = arith.constant 0.000000e+00 : f32
    %33 = vector.broadcast %cst_11 : f32 to vector<8x128xf32>
    %34 = vector.broadcast %cst_12 : f32 to vector<8x128xf32>
    %35 = arith.select %32, %33, %34 : vector<8x128xi1>, vector<8x128xf32>
    %cst_13 = arith.constant 4.500000e-01 : f32
    %36 = vector.broadcast %cst_13 : f32 to vector<8x128xf32>
    %37 = arith.mulf %36, %5 : vector<8x128xf32>
    %38 = arith.addf %37, %30 : vector<8x128xf32>
    %39 = arith.subf %38, %35 : vector<8x128xf32>
    %cst_14 = arith.constant 1.000000e+00 : f32
    %40 = vector.broadcast %cst_14 : f32 to vector<8x128xf32>
    %41 = arith.cmpf ogt, %39, %40 : vector<8x128xf32>
    %cst_15 = arith.constant 1.000000e+00 : f32
    %cst_16 = arith.constant 0.000000e+00 : f32
    %42 = vector.broadcast %cst_15 : f32 to vector<8x128xf32>
    %43 = vector.broadcast %cst_16 : f32 to vector<8x128xf32>
    %44 = arith.select %41, %42, %43 : vector<8x128xi1>, vector<8x128xf32>
    %45 = arith.truncf %44 : vector<8x128xf32> to vector<8x128xbf16>
    %cst_17 = arith.constant dense<0.000000e+00> : vector<8x128xf32>
    %46 = tpu.matmul %45, %3, %cst_17 {dimension_numbers = #tpu.dot_dimension_numbers<[1], [0], [0], [1], [0, 0, 1, 1], [], []>} : vector<8x128xbf16>, vector<128x128xbf16>, vector<8x128xf32> -> vector<8x128xf32>
    %47 = vector.broadcast %4 : vector<1x128xf32> to vector<8x128xf32>
    %48 = arith.addf %46, %47 : vector<8x128xf32>
    %c0_18 = arith.constant 0 : index
    %c0_19 = arith.constant 0 : index
    %49 = vector.load %arg7[%c0_18, %c0_19] : memref<8x128xf32, #tpu.memory_space<vmem>>, vector<8x128xf32>
    tpu.vector_store %arg7[%c0_18, %c0_19], %39 {strides = array<i32>} : memref<8x128xf32, #tpu.memory_space<vmem>>, vector<8x128xf32>,
    %c0_20 = arith.constant 0 : index
    %c0_21 = arith.constant 0 : index
    %50 = vector.load %arg8[%c0_20, %c0_21] : memref<8x128xf32, #tpu.memory_space<vmem>>, vector<8x128xf32>
    tpu.vector_store %arg8[%c0_20, %c0_21], %48 {strides = array<i32>} : memref<8x128xf32, #tpu.memory_space<vmem>>, vector<8x128xf32>,
    return
  }
}

</mosaic_0001>

<bundles_post_ra>
// kernel: step.1
= control target key start
LH: loop header
LB: loop body
LE: loop exit
PB: predicated region body
PF: predicated region fallthrough
CT: control target
= control target key end

     0   :  { %14 = vsyncpa [#allocation3], 0  ;;  %s473_s0 = inlined_call_operand.vmem [shape: f32[8,4], index: 0, kind: input, shape index: {}]   ;;  %s474_s1 = inlined_call_operand.hbm [shape: f32[4,128], index: 1, kind: input, shape index: {}]   ;;  %s475_s2 = inlined_call_operand.vmem [shape: f32[1,128], index: 2, kind: input, shape index: {}]   ;;  %s476_s3 = inlined_call_operand.vmem [shape: bf16[128,128], index: 3, kind: input, shape index: {}]   ;;  %s477_s4 = inlined_call_operand.hbm [shape: f32[1,128], index: 4, kind: input, shape index: {}]   ;;  %s478_s5 = inlined_call_operand.vmem [shape: f32[8,128], index: 5, kind: input, shape index: {}, may-alias: {5,7}]   ;;  %s479_s6 = inlined_call_operand.vmem [shape: f32[8,128], index: 6, kind: input, shape index: {}, may-alias: {6,8}]   ;;  %s480_s7 = inlined_call_operand.vmem [shape: f32[8,128], index: 7, kind: output, shape index: {0}, may-alias: {5,7}]   ;;  %s481_s8 = inlined_call_operand.vmem [shape: f32[8,128], index: 8, kind: output, shape index: {1}, may-alias: {6,8}]  }
   0x1   :  { %15 = vsyncpa [#allocation5], 0  ;;  %s346_s27 = smov [#allocation2]   ;;  %s347_s29 = smov [#allocation4]  }
   0x2   :  { %s24_s28 = sshll.u32 %s346_s27, 4  ;;  %s38_s30 = sshll.u32 %s347_s29, 4  ;;  %s25_s28 = int_to_ptr.vmem [resolvable:$true] %s24_s28  ;;  %s39_s30 = int_to_ptr.vmem [resolvable:$true] %s38_s30 }
   0x3   :  { %s298_s11 = scalar_lea.hbm %s474_s1, 64 }
   0x4   :  { %p299_p0 = scmp.ne.s32.totalorder %s474_s1, %s298_s11  ;;  %p302_p1 = scmp.lt.u32.totalorder %s298_s11, %s474_s1 }
   0x6   :  { %p304_p2 = pnand %p302_p1, %p299_p0 }
   0x8   :  { %307 = shalt.err (!%p304_p2)
}
   0x9   :  { %s308_s15 = scalar_lea.vmem %s25_s28, 64  ;;  %p313_p4 = scmp.lt.s32.totalorder %s25_s28, %s25_s28 }
   0xa   :  { %p309_p3 = scmp.ne.s32.totalorder %s25_s28, %s308_s15  ;;  %p314_p5 = scmp.lt.s32.totalorder %s308_s15, %s308_s15 }
   0xc   :  { %p315_p6 = por %p314_p5, %p313_p4 }
   0xe   :  { %p316_p7 = pnand %p315_p6, %p309_p3 }
  0x10   :  { %319 = shalt.err (!%p316_p7)
}
  0x11   :  { %27 = dma.hbm_to_vmem [thread:$0]  %s474_s1, 64, %s25_s28, [#allocation3]  }
  0x12   :  { %s320_s20 = scalar_lea.hbm %s477_s4, 16 }
  0x13   :  { %p321_p8 = scmp.ne.s32.totalorder %s477_s4, %s320_s20  ;;  %p324_p9 = scmp.lt.u32.totalorder %s320_s20, %s477_s4 }
  0x15   :  { %p326_p10 = pnand %p324_p9, %p321_p8 }
  0x17   :  { %329 = shalt.err (!%p326_p10)
}
  0x18   :  { %s330_s25 = scalar_lea.vmem %s39_s30, 16  ;;  %s334_s26 = scalar_lea.vmem %s39_s30, 32 }
  0x19   :  { %p331_p11 = scmp.ne.s32.totalorder %s39_s30, %s330_s25  ;;  %p335_p12 = scmp.lt.s32.totalorder %s39_s30, %s39_s30 }
  0x1a   :  { %p336_p13 = scmp.lt.s32.totalorder %s334_s26, %s330_s25 }
  0x1c   :  { %p337_p0 = por %p336_p13, %p335_p12 }
  0x1e   :  { %p338_p1 = pnand %p337_p0, %p331_p11 }
  0x20   :  { %341 = shalt.err (!%p338_p1)
}
  0x21   :  { %41 = dma.hbm_to_vmem [thread:$0]  %s477_s4, 16, %s39_s30, [#allocation5]  }
  0x22   :  { %342 = dma.done.wait [#allocation3], 64  }
  0x23   :  { %343 = vsyncadd [#allocation3], 4294967232 }
  0x24   :  { %344 = dma.done.wait [#allocation5], 16  }
  0x25   :  { %345 = vsyncadd [#allocation5], 4294967280  ;;  %v348_v0 = vmov 0   ;;  %v349_v1 = vmov 2   ;;  %v350_v2 = vmov 0.0   ;;  %v53_v3 = vld [vmem:[%s473_s0] sm:$0xff]  ;;  %v79_v14 = vlaneseq }
  0x26   :  { %285 = vset.pattern.permute.xlu0 %v348_v0  ;;  %287 = vset.pattern.permute.xlu1 %v349_v1  ;;  %v290_v4 = vld [vmem:[%s476_s3] sm:$0xff]   ;;  %v291_v5 = vld [vmem:[%s476_s3 + $0x8] sm:$0xff]   ;;  %v351_v6 = vmov 1   ;;  %v352_v7 = vmov 3   ;;  %v292_v8 = vld [vmem:[%s476_s3 + $0x10] sm:$0xff]   ;;  %vm353_vm0 = vmmov 0  }
  0x27   :  { %256 = vmatprep.subr.bf16.mxu0 %v350_v2  ;;  %76 = vperm.xlu0 %285, %v53_v3   ;;  %v293_v9 = vld [vmem:[%s476_s3 + $0x18] sm:$0xff]   ;;  %v294_v10 = vld [vmem:[%s476_s3 + $0x20] sm:$0xff]   ;;  %v295_v11 = vld [vmem:[%s476_s3 + $0x28] sm:$0xff]   ;;  %v80_v15 = vshrl.u32 %v79_v14, 7  ;;  %v354_v43 = vmov 1.0|1.0  }
  0x28   :  { %102 = vperm.xlu1 %287, %v53_v3   ;;  %257 = vmatpush3.bf16.msra.mxu0 %v290_v4  ;;  %v296_v12 = vld [vmem:[%s476_s3 + $0x30] sm:$0xff]   ;;  %v297_v13 = vld [vmem:[%s476_s3 + $0x38] sm:$0xff]   ;;  %v54_v17 = vld [vmem:[#allocation2] sm:$0xf] }
  0x29   :  { %258 = vmatprep.subr.bf16.mxu0 %v350_v2  ;;  %272 = vmatprep.mubr.msk.bf16.mxu0 %vm353_vm0, %v350_v2  ;;  %v81_v16 = vsub.s32 0, %v80_v15  ;;  %v97_v19 = vsub.s32 1, %v80_v15  ;;  %v107_v21 = vsub.s32 2, %v80_v15  ;;  %v117_v23 = vsub.s32 3, %v80_v15  ;;  %v235_v26 = vld [vmem:[%s475_s2] ss:$0 sm:$0xff] }
  0x2a   :  { %v73_v33 = vld [vmem:[%s478_s5] sm:$0xff] }
  0x2b   :  { %286 = vset.pattern.permute.xlu0 %v351_v6  ;;  %v82_v18 = vrot.slane %v54_v17, %v81_v16  ;;  %v98_v25 = vrot.slane %v54_v17, %v97_v19  ;;  %v108_v27 = vrot.slane %v54_v17, %v107_v21  ;;  %v118_v28 = vrot.slane %v54_v17, %v117_v23  ;;  %v236_v44 = vld [vmem:[#allocation4] ss:$0 sm:$0xff] }
  0x2c   :  { %288 = vset.pattern.permute.xlu1 %v352_v7  ;;  %92 = vperm.xlu0 %286, %v53_v3   ;;  %v123_v37 = vmul.f32 0.45, %v73_v33  ;;  %vm121_vm1 = vcmp.gt.f32.partialorder %v73_v33, 1.0 }
  0x2d   :  { %112 = vperm.xlu1 %288, %v53_v3   ;;  %259 = vmatpush3.bf16.msra.mxu0 %v291_v5  ;;  %v122_v40 = vsel %vm121_vm1, 1.0, %v350_v2 }
  0x2e   :  { %260 = vmatprep.subr.bf16.mxu0 %v350_v2 }
  0x30   :  { %289 = vset.pattern.permute.xlu0 %v352_v7 }
  0x31   :  { %261 = vmatpush3.bf16.msra.mxu0 %v292_v8 }
  0x32   :  { %262 = vmatprep.subr.bf16.mxu0 %v350_v2 }
  0x35   :  { %263 = vmatpush3.bf16.msra.mxu0 %v293_v9 }
  0x36   :  { %264 = vmatprep.subr.bf16.mxu0 %v350_v2 }
  0x39   :  { %265 = vmatpush3.bf16.msra.mxu0 %v294_v10 }
  0x3a   :  { %266 = vmatprep.subr.bf16.mxu0 %v350_v2 }
  0x3d   :  { %267 = vmatpush3.bf16.msra.mxu0 %v295_v11 }
  0x3e   :  { %268 = vmatprep.subr.bf16.mxu0 %v350_v2 }
  0x41   :  { %269 = vmatpush3.bf16.msra.mxu0 %v296_v12 }
  0x42   :  { %270 = vmatprep.subr.bf16.mxu0 %v350_v2 }
  0x45   :  { %271 = vmatpush3.bf16.msra.mxu0 %v297_v13 }
  0xa6   :  { %v77_v20 = vpop.permute.xlu0 %76 }
  0xa7   :  { %v103_v22 = vpop.permute.xlu1 %102  ;;  %v83_v24 = vmul.f32 %v82_v18, %v77_v20 }
  0xa8   :  { %v109_v34 = vmul.f32 %v108_v27, %v103_v22 }
  0xa9   :  { %v90_v31 = vadd.f32 %v235_v26, %v83_v24 }
  0xab   :  { %v93_v29 = vpop.permute.xlu0 %92 }
  0xac   :  { %v113_v30 = vpop.permute.xlu1 %112  ;;  %v99_v32 = vmul.f32 %v98_v25, %v93_v29 }
  0xad   :  { %v119_v36 = vmul.f32 %v118_v28, %v113_v30 }
  0xae   :  { %v100_v35 = vadd.f32 %v99_v32, %v90_v31 }
  0xb0   :  { %v110_v38 = vadd.f32 %v109_v34, %v100_v35 }
  0xb2   :  { %v120_v39 = vadd.f32 %v119_v36, %v110_v38 }
  0xb4   :  { %v124_v41 = vadd.f32 %v123_v37, %v120_v39 }
  0xb6   :  { %v125_v42 = vsub.f32 %v124_v41, %v122_v40 }
  0xb8   :  { %vm126_vm2 = vcmp.gt.f32.partialorder %v125_v42, 1.0  ;;  %223 = vst [vmem:[%s480_s7] sm:$0xff] %v125_v42 }
  0xb9   :  { %vm245_vm3 = vmpackc.low %vm126_vm2, %vm126_vm2 }
  0xba   :  { %273 = vmatmul.mubr.msk.bf16.vlgmr.msra.gmra.mrb[0].mxu0 %vm245_vm3, %v354_v43 }
 0x18d   :  { %v217_v45 = vpop.f32.mrb[0].mxu0 }
 0x18e   :  { %v218_v46 = vadd.f32 %v236_v44, %v217_v45  ;;  %v274_v47 = vpop.f32.mrb[1].mxu0 }
 0x18f   :  { %v220_v48 = vpop.f32.mrb[2].mxu0 }
 0x190   :  { %224 = vst [vmem:[%s481_s8] sm:$0xff] %v218_v46  ;;  %v275_v49 = vpop.f32.mrb[3].mxu0 }
 0x191   :  { %233 = vsyncpa [#allocation3], 1 }
 0x192   :  { %234 = vsyncpa [#allocation5], 1 }

</bundles_post_ra>
